<compile_context>
chip_gen: v5e
topology: v5e:2x2
jax: 0.10.0
libtpu: 0.0.40
codegen_flags: <defaults>
</compile_context>

<pallas_src>
import jax
import jax.numpy as jnp
from jax import lax
from jax.experimental import pallas as pl
from jax.experimental.pallas import tpu as pltpu


def _make_kernel(Cin, Cout, K, S, Q, Fout, T, eps, has_inject):
    N = Fout * T

    def compute(x_ref, wdw_ref, bdw_ref, wpw_ref, bpw_ref, g_ref, bt_ref, inj_ref):
        # x_ref: (S, Cin, G*T)   wdw: (Cin, K)   bdw: (Cin, 1)
        # wpw: (Cout, Cin)       bpw/gamma/beta: (Cout, 1)
        wdw = wdw_ref[...]

        # ---- depthwise conv (groups=Cin, kernel [K,1], stride [S,1]) --------
        # tap k = q*S + r contributes wdw[:, k] * xpad[:, (f+q)*S + r, :]
        # which, in the residue-major layout, is the contiguous lane slice
        # x_ref[r, :, q*T : (q+Fout)*T]  -> shape (Cin, Fout*T).
        y_dw = jnp.broadcast_to(bdw_ref[...], (Cin, N))        # conv bias init
        for q in range(Q):
            for r in range(S):
                k = q * S + r
                if k >= K:
                    continue
                slab = x_ref[r, :, q * T:(q + Fout) * T]       # (Cin, Fout*T)
                y_dw = y_dw + wdw[:, k:k + 1] * slab

        # ---- pointwise 1x1 conv: single MXU matmul --------------------------
        y = jnp.dot(wpw_ref[...], y_dw, preferred_element_type=jnp.float32)
        y = y + bpw_ref[...]                                   # (Cout, Fout*T)

        # ---- GroupNorm(num_groups=1, Cout): fused stats over (C, F, T) ------
        cnt = float(Cout * N)
        mean = jnp.sum(y) / cnt
        var = jnp.maximum(jnp.sum(y * y) / cnt - mean * mean, 0.0)
        inv = lax.rsqrt(var + eps)
        scale = g_ref[...] * inv                               # (Cout, 1)
        shift = bt_ref[...] - mean * scale                     # (Cout, 1)
        y = y * scale + shift                                  # one pass

        if has_inject:
            y = y + inj_ref[...]
        return y

    if has_inject:
        def kernel(x_ref, wdw_ref, bdw_ref, wpw_ref, bpw_ref, g_ref, bt_ref,
                   inj_ref, o_ref):
            o_ref[...] = compute(x_ref, wdw_ref, bdw_ref, wpw_ref, bpw_ref,
                                 g_ref, bt_ref, inj_ref).astype(o_ref.dtype)
    else:
        def kernel(x_ref, wdw_ref, bdw_ref, wpw_ref, bpw_ref, g_ref, bt_ref,
                   o_ref):
            o_ref[...] = compute(x_ref, wdw_ref, bdw_ref, wpw_ref, bpw_ref,
                                 g_ref, bt_ref, None).astype(o_ref.dtype)

    return kernel


def efficient_henc_layer(x, params, *, kernel_size=8, stride=4, pad=True,
                         inject=None, eps=1e-5):
    """x: (B, Cin, F, T) f32.  params = (wdw, bdw, wpw, bpw, gamma, beta)."""
    B, Cin, F, T = x.shape
    wdw, bdw, wpw, bpw, gamma, beta = params
    Cout = wpw.shape[0]
    K, S = kernel_size, stride
    p = K // 4 if pad else 0

    Fpad0 = F + 2 * p
    Fout = (Fpad0 - K) // S + 1
    Q = -(-K // S)                  # ceil(K / S) taps per residue
    G = Fout + Q - 1                # freq row-groups the kernel reads
    H = G * S                       # freq extent after pad/crop (multiple of S)
    N = Fout * T

    # Zero-pad left by p; pad or crop on the right so the freq extent is exactly
    # H.  The conv only reads padded rows [0, (Fout-1)*S + K) which are all < H,
    # so any cropped trailing rows were never used.
    right = H - (F + p)
    if right >= 0:
        xe = jnp.pad(x, ((0, 0), (0, 0), (p, right), (0, 0)))
    else:
        xe = jnp.pad(x[:, :, :H - p, :], ((0, 0), (0, 0), (p, 0), (0, 0)))

    # Residue-major, lane-dense layout: (B, S, Cin, G*T).  XLA fuses the
    # pad + transpose + reshapes into a single copy of the input.
    xr = (xe.reshape(B, Cin, G, S, T)
            .transpose(0, 3, 1, 2, 4)
            .reshape(B, S, Cin, G * T))

    has_inject = inject is not None
    kernel = _make_kernel(Cin, Cout, K, S, Q, Fout, T, eps, has_inject)

    in_specs = [
        pl.BlockSpec((None, S, Cin, G * T), lambda b: (b, 0, 0, 0)),
        pl.BlockSpec((Cin, K), lambda b: (0, 0)),
        pl.BlockSpec((Cin, 1), lambda b: (0, 0)),
        pl.BlockSpec((Cout, Cin), lambda b: (0, 0)),
        pl.BlockSpec((Cout, 1), lambda b: (0, 0)),
        pl.BlockSpec((Cout, 1), lambda b: (0, 0)),
        pl.BlockSpec((Cout, 1), lambda b: (0, 0)),
    ]
    args = [xr, wdw, bdw.reshape(Cin, 1), wpw, bpw.reshape(Cout, 1),
            gamma.reshape(Cout, 1), beta.reshape(Cout, 1)]
    if has_inject:
        in_specs.append(pl.BlockSpec((None, Cout, N), lambda b: (b, 0, 0)))
        args.append(inject.reshape(B, Cout, N))

    out = pl.pallas_call(
        kernel,
        out_shape=jax.ShapeDtypeStruct((B, Cout, N), x.dtype),
        grid=(B,),
        in_specs=in_specs,
        out_specs=pl.BlockSpec((None, Cout, N), lambda b: (b, 0, 0)),
        compiler_params=pltpu.CompilerParams(
            dimension_semantics=("parallel",),
            vmem_limit_bytes=64 * 1024 * 1024),
    )(*args)
    return out.reshape(B, Cout, Fout, T)


def reference(x, params, *, kernel_size=8, stride=4, pad=True, inject=None,
              eps=1e-5):
    """Pure-JAX reference matching the PyTorch module semantics."""
    wdw, bdw, wpw, bpw, gamma, beta = params
    B, Cin, F, T = x.shape
    Cout = wpw.shape[0]
    padding = kernel_size // 4 if pad else 0
    w = wdw.reshape(Cin, 1, kernel_size, 1)                  # OIHW, groups=Cin
    y = lax.conv_general_dilated(
        x, w, window_strides=(stride, 1),
        padding=((padding, padding), (0, 0)),
        dimension_numbers=('NCHW', 'OIHW', 'NCHW'),
        feature_group_count=Cin)
    y = y + bdw[None, :, None, None]
    w2 = wpw.reshape(Cout, Cin, 1, 1)
    y = lax.conv_general_dilated(
        y, w2, (1, 1), ((0, 0), (0, 0)),
        dimension_numbers=('NCHW', 'OIHW', 'NCHW'))
    y = y + bpw[None, :, None, None]
    mean = jnp.mean(y, axis=(1, 2, 3), keepdims=True)
    var = jnp.mean((y - mean) ** 2, axis=(1, 2, 3), keepdims=True)
    y = (y - mean) / jnp.sqrt(var + eps)
    y = y * gamma[None, :, None, None] + beta[None, :, None, None]
    if inject is not None:
        y = y + inject
    return y


if __name__ == "__main__":
    key = jax.random.PRNGKey(0)
    ks = jax.random.split(key, 8)

    # Small shapes: chin=4, chout=8, freq=16, time=8, kernel=8, stride=4.
    B, Cin, Cout, F, T = 2, 4, 8, 16, 8
    K, S = 8, 4
    Fout = (F + 2 * (K // 4) - K) // S + 1

    x = jax.random.normal(ks[0], (B, Cin, F, T), jnp.float32)
    wdw = 0.2 * jax.random.normal(ks[1], (Cin, K), jnp.float32)     # depthwise
    bdw = 0.1 * jax.random.normal(ks[2], (Cin,), jnp.float32)
    wpw = 0.3 * jax.random.normal(ks[3], (Cout, Cin), jnp.float32)  # pointwise
    bpw = 0.1 * jax.random.normal(ks[4], (Cout,), jnp.float32)
    gamma = 1.0 + 0.1 * jax.random.normal(ks[5], (Cout,), jnp.float32)
    beta = 0.1 * jax.random.normal(ks[6], (Cout,), jnp.float32)
    inject = jax.random.normal(ks[7], (B, Cout, Fout, T), jnp.float32)

    params = (wdw, bdw, wpw, bpw, gamma, beta)

    # With inject.
    y = efficient_henc_layer(x, params, kernel_size=K, stride=S, inject=inject)
    y = jax.block_until_ready(y)
    y_ref = reference(x, params, kernel_size=K, stride=S, inject=inject)
    err = float(jnp.max(jnp.abs(y - y_ref)))
    assert y.shape == (B, Cout, Fout, T), y.shape
    assert jnp.allclose(y, y_ref, atol=1e-4, rtol=1e-4), f"max abs err {err}"

    # Without inject (no zero tensor materialized / DMA'd).
    y0 = efficient_henc_layer(x, params, kernel_size=K, stride=S, inject=None)
    y0 = jax.block_until_ready(y0)
    y0_ref = reference(x, params, kernel_size=K, stride=S, inject=None)
    err0 = float(jnp.max(jnp.abs(y0 - y0_ref)))
    assert jnp.allclose(y0, y0_ref, atol=1e-4, rtol=1e-4), f"max abs err {err0}"

    print("KERNEL_OK")
</pallas_src>

<mosaic_0001>
module attributes {stable_mosaic.version = 11 : i64} {
  func.func @kernel(%arg0: i32, %arg1: memref<1x4x4x40xf32, #tpu.memory_space<vmem>>, %arg2: memref<4x8xf32, #tpu.memory_space<vmem>>, %arg3: memref<4x1xf32, #tpu.memory_space<vmem>>, %arg4: memref<8x4xf32, #tpu.memory_space<vmem>>, %arg5: memref<8x1xf32, #tpu.memory_space<vmem>>, %arg6: memref<8x1xf32, #tpu.memory_space<vmem>>, %arg7: memref<8x1xf32, #tpu.memory_space<vmem>>, %arg8: memref<1x8x32xf32, #tpu.memory_space<vmem>>, %arg9: memref<1x8x32xf32, #tpu.memory_space<vmem>>) attributes {dimension_semantics = [#tpu.dimension_semantics<parallel>], iteration_bounds = array<i64: 2>, scalar_prefetch = 0 : i64, scratch_operands = 0 : i64, tpu.core_type = #tpu.core_type<tc>, window_params = [{transform_indices = @transform_0, window_bounds = array<i64: 1, 4, 4, 40>}, {pipeline_mode = #tpu.pipeline_mode<synchronous>, transform_indices = @transform_1, window_bounds = array<i64: 4, 8>}, {pipeline_mode = #tpu.pipeline_mode<synchronous>, transform_indices = @transform_2, window_bounds = array<i64: 4, 1>}, {pipeline_mode = #tpu.pipeline_mode<synchronous>, transform_indices = @transform_3, window_bounds = array<i64: 8, 4>}, {pipeline_mode = #tpu.pipeline_mode<synchronous>, transform_indices = @transform_4, window_bounds = array<i64: 8, 1>}, {pipeline_mode = #tpu.pipeline_mode<synchronous>, transform_indices = @transform_5, window_bounds = array<i64: 8, 1>}, {pipeline_mode = #tpu.pipeline_mode<synchronous>, transform_indices = @transform_6, window_bounds = array<i64: 8, 1>}, {transform_indices = @transform_7, window_bounds = array<i64: 1, 8, 32>}, {transform_indices = @transform_8, window_bounds = array<i64: 1, 8, 32>}]} {
    %c0 = arith.constant 0 : index
    %c0_0 = arith.constant 0 : index
    %0 = vector.load %arg2[%c0, %c0_0] : memref<4x8xf32, #tpu.memory_space<vmem>>, vector<4x8xf32>
    %c0_1 = arith.constant 0 : index
    %c0_2 = arith.constant 0 : index
    %1 = vector.load %arg3[%c0_1, %c0_2] : memref<4x1xf32, #tpu.memory_space<vmem>>, vector<4x1xf32>
    %2 = vector.shape_cast %1 : vector<4x1xf32> to vector<4x1xf32>
    %3 = vector.broadcast %2 : vector<4x1xf32> to vector<4x32xf32>
    %c0_3 = arith.constant 0 : index
    %c0_4 = arith.constant 0 : index
    %c0_5 = arith.constant 0 : index
    %c0_6 = arith.constant 0 : index
    %4 = vector.load %arg1[%c0_3, %c0_4, %c0_5, %c0_6] : memref<1x4x4x40xf32, #tpu.memory_space<vmem>>, vector<1x1x4x32xf32>
    %5 = vector.shape_cast %4 : vector<1x1x4x32xf32> to vector<4x32xf32>
    %6 = vector.extract_strided_slice %0 {offsets = [0, 0], sizes = [4, 1], strides = [1, 1]} : vector<4x8xf32> to vector<4x1xf32>
    %7 = vector.broadcast %6 : vector<4x1xf32> to vector<4x32xf32>
    %8 = arith.mulf %7, %5 : vector<4x32xf32>
    %9 = arith.addf %3, %8 : vector<4x32xf32>
    %c0_7 = arith.constant 0 : index
    %c1 = arith.constant 1 : index
    %c0_8 = arith.constant 0 : index
    %c0_9 = arith.constant 0 : index
    %10 = vector.load %arg1[%c0_7, %c1, %c0_8, %c0_9] : memref<1x4x4x40xf32, #tpu.memory_space<vmem>>, vector<1x1x4x32xf32>
    %11 = vector.shape_cast %10 : vector<1x1x4x32xf32> to vector<4x32xf32>
    %12 = vector.extract_strided_slice %0 {offsets = [0, 1], sizes = [4, 1], strides = [1, 1]} : vector<4x8xf32> to vector<4x1xf32>
    %13 = vector.broadcast %12 : vector<4x1xf32> to vector<4x32xf32>
    %14 = arith.mulf %13, %11 : vector<4x32xf32>
    %15 = arith.addf %9, %14 : vector<4x32xf32>
    %c0_10 = arith.constant 0 : index
    %c2 = arith.constant 2 : index
    %c0_11 = arith.constant 0 : index
    %c0_12 = arith.constant 0 : index
    %16 = vector.load %arg1[%c0_10, %c2, %c0_11, %c0_12] : memref<1x4x4x40xf32, #tpu.memory_space<vmem>>, vector<1x1x4x32xf32>
    %17 = vector.shape_cast %16 : vector<1x1x4x32xf32> to vector<4x32xf32>
    %18 = vector.extract_strided_slice %0 {offsets = [0, 2], sizes = [4, 1], strides = [1, 1]} : vector<4x8xf32> to vector<4x1xf32>
    %19 = vector.broadcast %18 : vector<4x1xf32> to vector<4x32xf32>
    %20 = arith.mulf %19, %17 : vector<4x32xf32>
    %21 = arith.addf %15, %20 : vector<4x32xf32>
    %c0_13 = arith.constant 0 : index
    %c3 = arith.constant 3 : index
    %c0_14 = arith.constant 0 : index
    %c0_15 = arith.constant 0 : index
    %22 = vector.load %arg1[%c0_13, %c3, %c0_14, %c0_15] : memref<1x4x4x40xf32, #tpu.memory_space<vmem>>, vector<1x1x4x32xf32>
    %23 = vector.shape_cast %22 : vector<1x1x4x32xf32> to vector<4x32xf32>
    %24 = vector.extract_strided_slice %0 {offsets = [0, 3], sizes = [4, 1], strides = [1, 1]} : vector<4x8xf32> to vector<4x1xf32>
    %25 = vector.broadcast %24 : vector<4x1xf32> to vector<4x32xf32>
    %26 = arith.mulf %25, %23 : vector<4x32xf32>
    %27 = arith.addf %21, %26 : vector<4x32xf32>
    %c0_16 = arith.constant 0 : index
    %c0_17 = arith.constant 0 : index
    %c0_18 = arith.constant 0 : index
    %c8 = arith.constant 8 : index
    %28 = vector.load %arg1[%c0_16, %c0_17, %c0_18, %c8] : memref<1x4x4x40xf32, #tpu.memory_space<vmem>>, vector<1x1x4x32xf32>
    %29 = vector.shape_cast %28 : vector<1x1x4x32xf32> to vector<4x32xf32>
    %30 = vector.extract_strided_slice %0 {offsets = [0, 4], sizes = [4, 1], strides = [1, 1]} : vector<4x8xf32> to vector<4x1xf32>
    %31 = vector.broadcast %30 : vector<4x1xf32> to vector<4x32xf32>
    %32 = arith.mulf %31, %29 : vector<4x32xf32>
    %33 = arith.addf %27, %32 : vector<4x32xf32>
    %c0_19 = arith.constant 0 : index
    %c1_20 = arith.constant 1 : index
    %c0_21 = arith.constant 0 : index
    %c8_22 = arith.constant 8 : index
    %34 = vector.load %arg1[%c0_19, %c1_20, %c0_21, %c8_22] : memref<1x4x4x40xf32, #tpu.memory_space<vmem>>, vector<1x1x4x32xf32>
    %35 = vector.shape_cast %34 : vector<1x1x4x32xf32> to vector<4x32xf32>
    %36 = vector.extract_strided_slice %0 {offsets = [0, 5], sizes = [4, 1], strides = [1, 1]} : vector<4x8xf32> to vector<4x1xf32>
    %37 = vector.broadcast %36 : vector<4x1xf32> to vector<4x32xf32>
    %38 = arith.mulf %37, %35 : vector<4x32xf32>
    %39 = arith.addf %33, %38 : vector<4x32xf32>
    %c0_23 = arith.constant 0 : index
    %c2_24 = arith.constant 2 : index
    %c0_25 = arith.constant 0 : index
    %c8_26 = arith.constant 8 : index
    %40 = vector.load %arg1[%c0_23, %c2_24, %c0_25, %c8_26] : memref<1x4x4x40xf32, #tpu.memory_space<vmem>>, vector<1x1x4x32xf32>
    %41 = vector.shape_cast %40 : vector<1x1x4x32xf32> to vector<4x32xf32>
    %42 = vector.extract_strided_slice %0 {offsets = [0, 6], sizes = [4, 1], strides = [1, 1]} : vector<4x8xf32> to vector<4x1xf32>
    %43 = vector.broadcast %42 : vector<4x1xf32> to vector<4x32xf32>
    %44 = arith.mulf %43, %41 : vector<4x32xf32>
    %45 = arith.addf %39, %44 : vector<4x32xf32>
    %c0_27 = arith.constant 0 : index
    %c3_28 = arith.constant 3 : index
    %c0_29 = arith.constant 0 : index
    %c8_30 = arith.constant 8 : index
    %46 = vector.load %arg1[%c0_27, %c3_28, %c0_29, %c8_30] : memref<1x4x4x40xf32, #tpu.memory_space<vmem>>, vector<1x1x4x32xf32>
    %47 = vector.shape_cast %46 : vector<1x1x4x32xf32> to vector<4x32xf32>
    %48 = vector.extract_strided_slice %0 {offsets = [0, 7], sizes = [4, 1], strides = [1, 1]} : vector<4x8xf32> to vector<4x1xf32>
    %49 = vector.broadcast %48 : vector<4x1xf32> to vector<4x32xf32>
    %50 = arith.mulf %49, %47 : vector<4x32xf32>
    %51 = arith.addf %45, %50 : vector<4x32xf32>
    %c0_31 = arith.constant 0 : index
    %c0_32 = arith.constant 0 : index
    %52 = vector.load %arg4[%c0_31, %c0_32] : memref<8x4xf32, #tpu.memory_space<vmem>>, vector<8x4xf32>
    %cst = arith.constant dense<0.000000e+00> : vector<8x32xf32>
    %53 = tpu.matmul %52, %51, %cst {dimension_numbers = #tpu.dot_dimension_numbers<[1], [0], [0], [1], [0, 0, 1, 1], [], []>} : vector<8x4xf32>, vector<4x32xf32>, vector<8x32xf32> -> vector<8x32xf32>
    %c0_33 = arith.constant 0 : index
    %c0_34 = arith.constant 0 : index
    %54 = vector.load %arg5[%c0_33, %c0_34] : memref<8x1xf32, #tpu.memory_space<vmem>>, vector<8x1xf32>
    %55 = vector.broadcast %54 : vector<8x1xf32> to vector<8x32xf32>
    %56 = arith.addf %53, %55 : vector<8x32xf32>
    %57 = vector.shape_cast %56 : vector<8x32xf32> to vector<1x8x32xf32>
    %cst_35 = arith.constant dense<0.000000e+00> : vector<1xf32>
    %58 = vector.multi_reduction <add>, %57, %cst_35 [1, 2] : vector<1x8x32xf32> to vector<1xf32>
    %59 = vector.shape_cast %58 : vector<1xf32> to vector<1x1x1xf32>
    %60 = vector.extract %59[0, 0, 0] : f32 from vector<1x1x1xf32>
    %cst_36 = arith.constant 2.560000e+02 : f32
    %61 = arith.divf %60, %cst_36 : f32
    %62 = arith.mulf %56, %56 : vector<8x32xf32>
    %63 = vector.shape_cast %62 : vector<8x32xf32> to vector<1x8x32xf32>
    %cst_37 = arith.constant dense<0.000000e+00> : vector<1xf32>
    %64 = vector.multi_reduction <add>, %63, %cst_37 [1, 2] : vector<1x8x32xf32> to vector<1xf32>
    %65 = vector.shape_cast %64 : vector<1xf32> to vector<1x1x1xf32>
    %66 = vector.extract %65[0, 0, 0] : f32 from vector<1x1x1xf32>
    %cst_38 = arith.constant 2.560000e+02 : f32
    %67 = arith.divf %66, %cst_38 : f32
    %68 = arith.mulf %61, %61 : f32
    %69 = arith.subf %67, %68 : f32
    %cst_39 = arith.constant 0.000000e+00 : f32
    %70 = arith.maximumf %69, %cst_39 : f32
    %cst_40 = arith.constant 9.99999974E-6 : f32
    %71 = arith.addf %70, %cst_40 : f32
    %72 = math.rsqrt %71 : f32
    %c0_41 = arith.constant 0 : index
    %c0_42 = arith.constant 0 : index
    %73 = vector.load %arg6[%c0_41, %c0_42] : memref<8x1xf32, #tpu.memory_space<vmem>>, vector<8x1xf32>
    %74 = vector.broadcast %72 : f32 to vector<8x1xf32>
    %75 = arith.mulf %73, %74 : vector<8x1xf32>
    %c0_43 = arith.constant 0 : index
    %c0_44 = arith.constant 0 : index
    %76 = vector.load %arg7[%c0_43, %c0_44] : memref<8x1xf32, #tpu.memory_space<vmem>>, vector<8x1xf32>
    %77 = vector.broadcast %61 : f32 to vector<8x1xf32>
    %78 = arith.mulf %77, %75 : vector<8x1xf32>
    %79 = arith.subf %76, %78 : vector<8x1xf32>
    %80 = vector.broadcast %75 : vector<8x1xf32> to vector<8x32xf32>
    %81 = arith.mulf %56, %80 : vector<8x32xf32>
    %82 = vector.broadcast %79 : vector<8x1xf32> to vector<8x32xf32>
    %83 = arith.addf %81, %82 : vector<8x32xf32>
    %c0_45 = arith.constant 0 : index
    %c0_46 = arith.constant 0 : index
    %c0_47 = arith.constant 0 : index
    %84 = vector.load %arg8[%c0_45, %c0_46, %c0_47] : memref<1x8x32xf32, #tpu.memory_space<vmem>>, vector<1x8x32xf32>
    %85 = vector.shape_cast %84 : vector<1x8x32xf32> to vector<8x32xf32>
    %86 = arith.addf %83, %85 : vector<8x32xf32>
    %c0_48 = arith.constant 0 : index
    %c0_49 = arith.constant 0 : index
    %c0_50 = arith.constant 0 : index
    %87 = vector.load %arg9[%c0_48, %c0_49, %c0_50] : memref<1x8x32xf32, #tpu.memory_space<vmem>>, vector<1x8x32xf32>
    %88 = vector.shape_cast %87 : vector<1x8x32xf32> to vector<8x32xf32>
    %89 = vector.shape_cast %86 : vector<8x32xf32> to vector<1x8x32xf32>
    tpu.vector_store %arg9[%c0_48, %c0_49, %c0_50], %89 {strides = array<i32>} : memref<1x8x32xf32, #tpu.memory_space<vmem>>, vector<1x8x32xf32>,
    return
  }
  func.func @transform_0(%arg0: i32) -> (i32, i32, i32, i32) {
    %c0_i32 = arith.constant 0 : i32
    %c0_i32_0 = arith.constant 0 : i32
    %c0_i32_1 = arith.constant 0 : i32
    %c0_i32_2 = arith.constant 0 : i32
    return %arg0, %c0_i32, %c0_i32_0, %c0_i32_1 : i32, i32, i32, i32
  }
  func.func @transform_1(%arg0: i32) -> (i32, i32) {
    %c0_i32 = arith.constant 0 : i32
    %c0_i32_0 = arith.constant 0 : i32
    %c0_i32_1 = arith.constant 0 : i32
    return %c0_i32, %c0_i32_0 : i32, i32
  }
  func.func @transform_2(%arg0: i32) -> (i32, i32) {
    %c0_i32 = arith.constant 0 : i32
    %c0_i32_0 = arith.constant 0 : i32
    %c0_i32_1 = arith.constant 0 : i32
    return %c0_i32, %c0_i32_0 : i32, i32
  }
  func.func @transform_3(%arg0: i32) -> (i32, i32) {
    %c0_i32 = arith.constant 0 : i32
    %c0_i32_0 = arith.constant 0 : i32
    %c0_i32_1 = arith.constant 0 : i32
    return %c0_i32, %c0_i32_0 : i32, i32
  }
  func.func @transform_4(%arg0: i32) -> (i32, i32) {
    %c0_i32 = arith.constant 0 : i32
    %c0_i32_0 = arith.constant 0 : i32
    %c0_i32_1 = arith.constant 0 : i32
    return %c0_i32, %c0_i32_0 : i32, i32
  }
  func.func @transform_5(%arg0: i32) -> (i32, i32) {
    %c0_i32 = arith.constant 0 : i32
    %c0_i32_0 = arith.constant 0 : i32
    %c0_i32_1 = arith.constant 0 : i32
    return %c0_i32, %c0_i32_0 : i32, i32
  }
  func.func @transform_6(%arg0: i32) -> (i32, i32) {
    %c0_i32 = arith.constant 0 : i32
    %c0_i32_0 = arith.constant 0 : i32
    %c0_i32_1 = arith.constant 0 : i32
    return %c0_i32, %c0_i32_0 : i32, i32
  }
  func.func @transform_7(%arg0: i32) -> (i32, i32, i32) {
    %c0_i32 = arith.constant 0 : i32
    %c0_i32_0 = arith.constant 0 : i32
    %c0_i32_1 = arith.constant 0 : i32
    return %arg0, %c0_i32, %c0_i32_0 : i32, i32, i32
  }
  func.func @transform_8(%arg0: i32) -> (i32, i32, i32) {
    %c0_i32 = arith.constant 0 : i32
    %c0_i32_0 = arith.constant 0 : i32
    %c0_i32_1 = arith.constant 0 : i32
    return %arg0, %c0_i32, %c0_i32_0 : i32, i32, i32
  }
}

</mosaic_0001>

<bundles_post_ra>
// kernel: tpu_custom_call.1
= control target key start
LH: loop header
LB: loop body
LE: loop exit
PB: predicated region body
PF: predicated region fallthrough
CT: control target
= control target key end

     0   :  { %13 = vsyncpa [#allocation3], 0  ;;  %s1055_s0 = inlined_call_operand.hbm [shape: f32[2,4,4,40], index: 0, kind: input, shape index: {}]   ;;  %s1056_s1 = inlined_call_operand.vmem [shape: f32[4,8], index: 1, kind: input, shape index: {}]   ;;  %s1057_s2 = inlined_call_operand.vmem [shape: f32[4,1], index: 2, kind: input, shape index: {}]   ;;  %s1058_s3 = inlined_call_operand.vmem [shape: f32[8,4], index: 3, kind: input, shape index: {}]   ;;  %s1059_s4 = inlined_call_operand.vmem [shape: f32[8,1], index: 4, kind: input, shape index: {}]   ;;  %s1060_s5 = inlined_call_operand.vmem [shape: f32[8,1], index: 5, kind: input, shape index: {}]   ;;  %s1061_s6 = inlined_call_operand.vmem [shape: f32[8,1], index: 6, kind: input, shape index: {}]   ;;  %s1062_s7 = inlined_call_operand.vmem [shape: f32[2,8,32], index: 7, kind: input, shape index: {}]   ;;  %s1063_s8 = inlined_call_operand.hbm [shape: f32[2,8,32], index: 8, kind: output, shape index: {}]  }
   0x1   :  { %15 = vsyncpa [#allocation3 + $0x1], 0 }
   0x2   :  { %16 = vsyncpa [#allocation4], 0 }
   0x3   :  { %18 = vsyncpa [#allocation4 + $0x1], 0  ;;  %s889_s27 = smov 0   ;;  %s891_s28 = smov 0  }
   0x4   :  { %s893_s29 = smov 0   ;;  %s895_s30 = smov 0  }
   0x5 LB: > { %1065 = sst [smem:[#allocation8_spill]] %s825_s29  ;;  %s910_s9 = sadd.s32 4294967295, %s829_s30   ;;  %s829_s30 = sphi %s895_s30, %s1077_s30   ;;  %s825_s29 = sphi %s893_s29, %s1074_s29   ;;  %s821_s28 = sphi %s891_s28, %s1076_s28   ;;  %s817_s27 = sphi %s889_s27, %s1075_s27  }
   0x6   : > { %s633_s10 = sadd.s32 4294967294, %s829_s30   ;;  %s914_s11 = sadd.s32 1, %s829_s30  }
   0x7   : > { %s31_s12 = sadd.s32 1, %s825_s29  ;;  %s28_s13 = ssub.s32 %s829_s30, %s914_s11 }
   0x8   : > { %p38_p0 = scmp.ne.s32.totalorder %s825_s29, %s821_s28  ;;  %p29_p1 = scmp.eq.s32.totalorder %s28_s13, 0 }
   0x9   : > { %p39_p2 = scmp.eq.s32.totalorder %s829_s30, 0  ;;  %p44_p3 = scmp.ne.s32.totalorder %s821_s28, %s817_s27 }
   0xa   : > { %p45_p4 = scmp.eq.s32.totalorder %s910_s9, 0  ;;  %p220_p7 = scmp.eq.s32.totalorder %s910_s9, 1 }
   0xb   : > { %s926_s14 = scalar_select %p29_p1, %s825_s29, %s31_s12  }
   0xc   : > { %p928_p5 = por %p39_p2, %p38_p0  ;;  %p932_p6 = por %p45_p4, %p44_p3 }
   0xd   : > { %1066 = sst [smem:[#allocation9_spill]] %s926_s14  ;;  %p226_p8 = scmp.eq.s32.totalorder %s633_s10, 1 }
   0xe   : > { %p673_p10 = scmp.lt.s32.totalorder %s829_s30, 2  ;;  %p939_p11 = por %p220_p7, %p38_p0 }
   0xf   : > { %p943_p12 = por %p226_p8, %p44_p3  ;;  %s264_s19 = sand.u32 1, %s825_s29  }
  0x10   : > { %s652_s20 = sshll.u32 %s829_s30, 4  ;;  %s636_s21 = sshll.u32 %s264_s19, 4 }
  0x11   : > { %s273_s24 = scalar_lea.hbm %s1055_s0, %s652_s20  ;;  %s268_s26 = scalar_lea.vmem [#allocation2], %s636_s21 }
  0x12   : > { %s274_s25 = sshll.u32 %s273_s24, 4  ;;  %s276_s10 = sshll.u32 %s268_s26, 4  ;;  %s275_s25 = int_to_ptr.hbm [resolvable:$true] %s274_s25  ;;  %s277_s10 = int_to_ptr.vmem [resolvable:$true] %s276_s10 }
  0x13   : > { %p954_p13 = pnand %p673_p10, %p928_p5  ;;  %p639_p0 = scmp.ge.s32.totalorder %s829_s30, 1 }
  0x14   : > { %p291_p1 = scmp.lt.s32.totalorder %s829_s30, 3  ;;  %s265_s13 = scalar_lea.sflag [#allocation3], %s264_s19 }
  0x15   : > { %s733_s14 = sshra.s32 %s275_s25, 4  ;;  %p737_p3 = pneg %p954_p13  ;;  %s734_s14 = int_to_ptr.hbm [resolvable:$true] %s733_s14 }
  0x16   : > { %s735_s29 = scalar_lea.hbm %s734_s14, 16  ;;  %s740_s15 = scalar_lea.hbm %s1055_s0, 32 }
  0x17   : > { %p736_p2 = scmp.ne.s32.totalorder %s734_s14, %s735_s29  ;;  %p741_p5 = scmp.lt.s32.totalorder %s734_s14, %s1055_s0 }
  0x18   : > { %p742_p8 = scmp.lt.s32.totalorder %s740_s15, %s735_s29 }
  0x19   : > { %p738_p4 = pnand %p737_p3, %p736_p2 }
  0x1a   : > { %p743_p10 = por %p742_p8, %p741_p5 }
  0x1b   : > { %p739_p7 = pneg %p738_p4 }
  0x1d   : > { %p744_p9 = pnand %p743_p10, %p739_p7 }
  0x1f   : > { %747 = shalt.err (!%p744_p9)
}
  0x20   : > { %s831_s19 = smov 64   ;;  %s832_s24 = smov 4  }
  0x21   : > { %668 = dma.hbm_to_vmem [thread:$0]  (!%p954_p13), %s275_s25, 256, %s277_s10, %s265_s13, %s831_s19, %s831_s19, %s832_s24  }
  0x22   : > { %p292_p2 = pnand %p639_p0, %p291_p1 }
  0x23   : > { %s975_s26 = sand.u32 (!%p292_p2), 1, %s821_s28  }
  0x24   : > { %295 = sbr.rel (%p292_p2) target bundleno = 808 (0x328), region = 52  ;;  %s640_s29 = sshll.u32 (!%p292_p2), %s975_s26, 4 }
  0x25   : > { %s298_s14 = scalar_lea.sflag (!%p292_p2), [#allocation3], %s975_s26  ;;  %s979_s20 = scalar_lea.vmem (!%p292_p2), [#allocation2], %s640_s29 }
  0x29   : > { %808 = dma.done.wait (%p932_p6), %s298_s14, 256  }
  0x2a   : > { %810 = vsyncadd (%p932_p6), %s298_s14, 4294967040  ;;  %v833_v0 = vmov 4   ;;  %v834_v1 = vmov 6   ;;  %v835_v2 = vmov 0   ;;  %v343_v3 = vld [vmem:[%s1056_s1] sm:$0xf] }
  0x2b   : > { %720 = vset.pattern.permute.xlu0 %v833_v0  ;;  %722 = vset.pattern.permute.xlu1 %v834_v1  ;;  %v344_v4 = vld [vmem:[%s1057_s2] sm:$0xf]  ;;  %v836_v5 = vmov 5   ;;  %v837_v6 = vmov 7   ;;  %v838_v7 = vmov 1   ;;  %v839_v8 = vmov 3  }
  0x2c   : > { %724 = vset.pattern.permute.xlu2 %v835_v2  ;;  %383 = vperm.xlu0 %720, %v343_v3   ;;  %v840_v9 = vmov 2   ;;  %v350_v10 = vld [vmem:[%s979_s20] sm:$0xf]  ;;  %s841_s16 = smov 120   ;;  %v644_v14 = vld [vmem:[%s979_s20 + $0x8] sm:$0xf] }
  0x2d   : > { %403 = vperm.xlu1 %722, %v343_v3   ;;  %353 = vperm.xlu2 %724, %v343_v3   ;;  %v643_v17 = vld [vmem:[%s979_s20 + $0x4] sm:$0xf]  ;;  %v645_v21 = vld [vmem:[%s979_s20 + $0xc] sm:$0xf]  ;;  %vm433_vm0 = vcmask 1043456   ;;  %vm429_vm1 = vcmask 31744  }
  0x2e   : > { %v423_v35 = vld [vmem:[%s1059_s4] sm:$0xff]  ;;  %vm457_vm2 = vcmask 261120   ;;  %v842_v51 = vmov 256.0   ;;  %s843_s12 = smov 0.0   ;;  %p339_p6 = scmp.lt.s32.totalorder %s910_s9, 1 }
  0x2f   : > { %v422_v44 = vld [vmem:[%s1058_s3] sm:$0xff]  ;;  %729 = vrcp.f32 %v842_v51 }
  0x34   : > { %721 = vset.pattern.permute.xlu0 %v836_v5 }
  0x35   : > { %723 = vset.pattern.permute.xlu1 %v837_v6  ;;  %393 = vperm.xlu0 %721, %v343_v3   ;;  %v730_v52 = vpop.eup %729 }
  0x36   : > { %413 = vperm.xlu1 %723, %v343_v3   ;;  %347 = vperm.xlu2 %724, %v344_v4   ;;  %v469_v53 = vmul.f32 256.0, %v730_v52  ;;  %vm473_vm3 = vweird.f32 %v730_v52 }
  0x38   : > { %v470_v54 = vsub.f32 1.0, %v469_v53 }
  0x3a   : > { %v471_v60 = vmul.f32 %v730_v52, %v470_v54 }
  0x3c   : > { %v472_v1 = vadd.f32 %v730_v52, %v471_v60 }
  0x3d   : > { %727 = vset.pattern.permute.xlu0 %v839_v8 }
  0x3e   : > { %725 = vset.pattern.permute.xlu1 %v838_v7  ;;  %377 = vperm.xlu0 %727, %v343_v3   ;;  %v474_v5 = vsel %vm473_vm3, %v730_v52, %v472_v1 }
  0x3f   : > { %361 = vperm.xlu1 %725, %v343_v3   ;;  %726 = vset.pattern.permute.xlu2 %v840_v9 }
  0x40   : > { %369 = vperm.xlu2 %726, %v343_v3  }
  0x46   : > { %728 = vset.pattern.permute.xlu0 %v835_v2 }
  0x47   : > { %426 = vperm.xlu0 %728, %v423_v35  }
  0x87   : > { %v354_v15 = vpop.permute.xlu2 %353 }
  0x88   : > { %v356_v22 = vmul.f32 %v354_v15, %v350_v10 }
  0x90   : > { %v348_v24 = vpop.permute.xlu2 %347 }
  0x91   : > { %v357_v25 = vadd.f32 %v356_v22, %v348_v24 }
  0x9a   : > { %v370_v30 = vpop.permute.xlu2 %369 }
  0x9b   : > { %v372_v31 = vmul.f32 %v644_v14, %v370_v30 }
  0x9e   : > { %v384_v11 = vpop.permute.xlu0 %383 }
  0x9f   : > { %v386_v12 = vmul.f32 %v384_v11, %v350_v10  ;;  %v404_v13 = vpop.permute.xlu1 %403 }
  0xa0   : > { %v406_v16 = vmul.f32 %v644_v14, %v404_v13 }
  0xa1   : > { %388 = vrot.lane.b32.xlu1 %v386_v12, %s841_s16 }
  0xa7   : > { %v394_v18 = vpop.permute.xlu0 %393 }
  0xa8   : > { %v396_v19 = vmul.f32 %v643_v17, %v394_v18  ;;  %v414_v20 = vpop.permute.xlu1 %413 }
  0xa9   : > { %408 = vrot.lane.b32.xlu1 %v406_v16, %s841_s16  ;;  %v416_v23 = vmul.f32 %v645_v21, %v414_v20  ;;  %v513_v16 = vld [vmem:[%s1060_s5] sm:$0xff] }
  0xaa   : > { %398 = vrot.lane.b32.xlu2 %v396_v19, %s841_s16 }
  0xb0   : > { %v378_v29 = vpop.permute.xlu0 %377 }
  0xb1   : > { %v362_v26 = vpop.permute.xlu1 %361  ;;  %v380_v32 = vmul.f32 %v645_v21, %v378_v29  ;;  %v516_v21 = vld [vmem:[%s1061_s6] sm:$0xff] }
  0xb2   : > { %v364_v27 = vmul.f32 %v643_v17, %v362_v26  ;;  %418 = vrot.lane.b32.xlu2 %v416_v23, %s841_s16 }
  0xb4   : > { %v365_v28 = vadd.f32 %v364_v27, %v357_v25 }
  0xb6   : > { %v373_v33 = vadd.f32 %v372_v31, %v365_v28 }
  0xb8   : > { %v381_v34 = vadd.f32 %v380_v32, %v373_v33 }
  0xb9   : > { %v427_v45 = vpop.permute.xlu0 %426 }
 0x104   : > { %v399_v36 = vpop.permute.xlu2 %398 }
 0x10c   : > { %v419_v41 = vpop.permute.xlu2 %418 }
 0x113   : > { %v389_v37 = vpop.permute.xlu1 %388 }
 0x114   : > { %v391_v38 = vadd.f32 %v389_v37, %v381_v34 }
 0x116   : > { %v401_v39 = vadd.f32 %v399_v36, %v391_v38 }
 0x11b   : > { %v409_v40 = vpop.permute.xlu1 %408 }
 0x11c   : > { %v411_v42 = vadd.f32 %v409_v40, %v401_v39 }
 0x11e   : > { %v421_v43 = vadd.f32 %v419_v41, %v411_v42 }
 0x120   : > { %646 = vmatpush.msk.msra.mxu0 %vm433_vm0, %v421_v43 }
 0x121   : > { %647 = vmatmul.msk.f32.vlgmr.msra.gmra.mxu0 %vm429_vm1, %v422_v44 }
 0x19e   : > { %v454_v46 = vpop.f32.mrf.mxu0 }
 0x19f   : > { %v1001_v47 = vadd.f32 %v454_v46, %v427_v45 }
 0x1a1   : > { %v458_v48 = vsel %vm457_vm2, %v1001_v47, 0.0  ;;  %v477_v49 = vmul.f32 %v1001_v47, %v1001_v47 }
 0x1a2   : > { %459 = vadd.xlane.f32.xlu1 %v458_v48 }
 0x1a3   : > { %v478_v50 = vsel %vm457_vm2, %v477_v49, 0.0 }
 0x1a4   : > { %479 = vadd.xlane.f32.xlu2 %v478_v50 }
 0x215   : > { %v460_v55 = vpop.xlane.xlu1 %459 }
 0x216   : > { %v461_v56 = vrot.slane %v460_v55, 4 }
 0x217   : > { %v480_v57 = vpop.xlane.xlu2 %479 }
 0x218   : > { %v462_v58 = vadd.f32 %v461_v56, %v460_v55  ;;  %v481_v59 = vrot.slane %v480_v57, 4 }
 0x21a   : > { %v463_v61 = vrot.slane %v462_v58, 2  ;;  %v482_v62 = vadd.f32 %v481_v59, %v480_v57 }
 0x21c   : > { %v483_v63 = vrot.slane %v482_v62, 2  ;;  %v464_v0 = vadd.f32 %v463_v61, %v462_v58 }
 0x21e   : > { %v484_v2 = vadd.f32 %v483_v63, %v482_v62  ;;  %v465_v3 = vrot.slane %v464_v0, 1 }
 0x220   : > { %v466_v4 = vadd.f32 %v465_v3, %v464_v0  ;;  %v485_v6 = vrot.slane %v484_v2, 1 }
 0x222   : > { %653 = vpush %v466_v4  ;;  %v486_v7 = vadd.f32 %v485_v6, %v484_v2 }
 0x223   : > { %655 = vpush %v474_v5 }
 0x224   : > { %657 = vpush %v486_v7 }
 0x253   : > { %s654_s19 = spop %653 }
 0x254   : > { %s656_s24 = spop %655 }
 0x255   : > { %s476_s29 = smul.f32 %s656_s24, %s654_s19  ;;  %s658_s14 = spop %657 }
 0x256   : > { %s496_s20 = smul.f32 %s658_s14, %s656_s24 }
 0x257   : > { %s497_s25 = smul.f32 %s476_s29, %s476_s29  ;;  %v517_v19 = vstv %s476_s29 }
 0x258   : > { %s340_s24 = scalar_select %p339_p6, %s910_s9, 1 }
 0x259   : > { %s498_s10 = ssub.f32 %s496_s20, %s497_s25  ;;  %s641_s20 = sshll.u32 %s975_s26, 3 }
 0x25a   : > { %s642_s14 = sshll.u32 %s340_s24, 3  ;;  %s649_s25 = sshll.u32 %s910_s9, 3 }
 0x25b   : > { %s499_s13 = smax.f32 %s843_s12, %s498_s10  ;;  %s546_s21 = scalar_lea.hbm %s1063_s8, %s649_s25 }
 0x25c   : > { %s500_s16 = sadd.f32 1e-05, %s499_s13  ;;  %s342_s13 = scalar_lea.vmem %s1062_s7, %s642_s14 }
 0x25d   : > { %v532_v25 = vld [vmem:[%s342_s13] sm:$0xff]  ;;  %s338_s15 = scalar_lea.vmem [#allocation5], %s641_s20  ;;  %s550_s23 = sshll.u32 %s546_s21, 4  ;;  %s551_s23 = int_to_ptr.hbm [resolvable:$true] %s550_s23 }
 0x25e   : > { %v501_v8 = vstv %s500_s16  ;;  %s536_s9 = scalar_lea.sflag [#allocation4], %s975_s26  ;;  %s777_s19 = sshra.s32 %s551_s23, 4  ;;  %s778_s19 = int_to_ptr.hbm [resolvable:$true] %s777_s19 }
 0x25f   : > { %731 = vrsqrt.f32 %v501_v8  ;;  %vm508_vm5 = vweird.f32 %v501_v8  ;;  %s779_s24 = scalar_lea.hbm %s778_s19, 8  ;;  %s783_s20 = scalar_lea.hbm %s1063_s8, 16 }
 0x260   : > { %p780_p9 = scmp.ne.s32.totalorder %s778_s19, %s779_s24  ;;  %p784_p1 = scmp.lt.s32.totalorder %s778_s19, %s1063_s8 }
 0x261   : > { %p785_p3 = scmp.lt.s32.totalorder %s783_s20, %s779_s24 }
 0x262   : > { %p781_p13 = pnand %p780_p9, %p939_p11 }
 0x263   : > { %p786_p4 = por %p785_p3, %p784_p1 }
 0x264   : > { %p782_p0 = pneg %p781_p13 }
 0x265   : > { %v732_v9 = vpop.eup %731 }
 0x266   : > { %v503_v10 = vmul.f32 %v732_v9, %v501_v8  ;;  %vm509_vm4 = vweird.f32 %v732_v9  ;;  %p787_p7 = pnand %p786_p4, %p782_p0 }
 0x267   : > { %vm510_vm6 = vmor %vm508_vm5, %vm509_vm4 }
 0x268   : > { %v504_v11 = vmul.f32 %v732_v9, %v503_v10 }
 0x26a   : > { %v505_v12 = vmul.f32 0.5, %v504_v11 }
 0x26c   : > { %v506_v13 = vsub.f32 1.5, %v505_v12 }
 0x26e   : > { %v507_v14 = vmul.f32 %v732_v9, %v506_v13 }
 0x270   : > { %v511_v15 = vsel %vm510_vm6, %v732_v9, %v507_v14 }
 0x271   : > { %659 = vpush %v511_v15 }
 0x2a2   : > { %s660_s22 = spop %659 }
 0x2a3   : > { %v514_v17 = vstv %s660_s22  ;;  %s548_s22 = sshll.u32 %s338_s15, 4  ;;  %s549_s22 = int_to_ptr.vmem [resolvable:$true] %s548_s22 }
 0x2a4   : > { %v515_v18 = vmul.f32 %v514_v17, %v513_v16 }
 0x2a6   : > { %522 = vperm.xlu0 %728, %v515_v18   ;;  %v518_v20 = vmul.f32 %v517_v19, %v515_v18 }
 0x2a8   : > { %v519_v22 = vsub.f32 %v516_v21, %v518_v20 }
 0x2ae   : > { %528 = vperm.xlu0 %728, %v519_v22  }
 0x318   : > { %v523_v23 = vpop.permute.xlu0 %522 }
 0x319   : > { %v525_v24 = vmul.f32 %v523_v23, %v1001_v47 }
 0x320   : > { %v529_v26 = vpop.permute.xlu0 %528 }
 0x321   : > { %v531_v27 = vadd.f32 %v529_v26, %v525_v24 }
 0x323   : > { %v533_v28 = vadd.f32 %v532_v25, %v531_v27 }
 0x325   : > { %534 = vst.msk [vmem:[%s338_s15] sm:$0xff] %vm457_vm2, %v533_v28 }
 0x326   : > { %790 = shalt.err (!%p787_p7)
}
 0x327   : > { %663 = dma.vmem_to_hbm [thread:$0]  (%p939_p11), %s549_s22, 128, %s551_s23, %s536_s9  }
 0x328 PF: > { %s562_s26 = sand.u32 1, %s817_s27   ;;  %p1072_p5 = scmp.ge.s32.totalorder %s829_s30, 2 }
 0x329   : > { %s563_s13 = scalar_lea.sflag [#allocation4], %s562_s26 }
 0x32a   : > { %p670_p8 = pnand %p1072_p5, %p943_p12 }
 0x32c   : > { %p671_p10 = pneg %p670_p8 }
 0x32e   : > { %812 = dma.done.wait (%p671_p10), %s563_s13, 128  }
 0x32f   : > { %814 = vsyncadd (%p671_p10), %s563_s13, 4294967168  ;;  %s1073_s16 = sld [smem:[#allocation8_spill]]  ;;  %p21_p2 = scmp.ge.s32.totalorder %s914_s11, 4  }
 0x330   : > { %s1074_s29 = sld [smem:[#allocation9_spill]]  ;;  %s1075_s27 = smov %s821_s28 }
 0x331   : > { %s1077_s30 = smov %s914_s11  ;;  %23 = sbr.rel (!%p21_p2) target bundleno = 5 (0x5), region = 103 }
 0x335   : > { %s1076_s28 = smov %s1073_s16 }
 0x336   :  { %569 = vsyncpa [#allocation3], 1 }
 0x337   :  { %571 = vsyncpa [#allocation3 + $0x1], 1 }
 0x338   :  { %572 = vsyncpa [#allocation4], 1 }
 0x339   :  { %574 = vsyncpa [#allocation4 + $0x1], 1 }

</bundles_post_ra>
